<compile_context>
chip_gen: v6e
topology: v6e:2x2x1
jax: 0.10.0
libtpu: 0.0.40
codegen_flags: <defaults>
</compile_context>

<pallas_src>
import functools

import jax
import jax.numpy as jnp
from jax.experimental import pallas as pl
from jax.experimental.pallas import tpu as pltpu

LANES = 128
SUBLANES = 8
MAX_TILE_ROWS = 2048          # (2048, 128) f32 block = 1 MiB per buffer
MIN_BLOCKS_PER_CORE = 4       # only split across cores if each gets >= 4 tiles


# ---------------------------------------------------------------------------
# Kernels (accumulate directly into the resident (8,128) output block)
# ---------------------------------------------------------------------------
def _softplus(z):
    # numerically stable softplus: max(z, 0) + log1p(exp(-|z|))
    return jnp.maximum(z, 0.0) + jnp.log1p(jnp.exp(-jnp.abs(z)))


def _tail_mask(blk, tile_rows, n_valid):
    row = jax.lax.broadcasted_iota(jnp.int32, (tile_rows, LANES), 0) + blk * tile_rows
    col = jax.lax.broadcasted_iota(jnp.int32, (tile_rows, LANES), 1)
    return (row * LANES + col) < n_valid


def _bce_pair_kernel(xr_ref, xf_ref, out_ref, *, steps, tile_rows, n_valid,
                     needs_mask):
    """out += tile-sum of softplus(-x_real) + softplus(x_fake)."""
    j = pl.program_id(1)

    @pl.when(j == 0)
    def _():
        out_ref[...] = jnp.zeros_like(out_ref)

    xr = xr_ref[...].astype(jnp.float32)
    xf = xf_ref[...].astype(jnp.float32)
    val = _softplus(-xr) + _softplus(xf)

    if needs_mask:  # static: only traced when the slab has an OOB/padded tail
        blk = pl.program_id(0) * steps + j
        val = jnp.where(_tail_mask(blk, tile_rows, n_valid), val, 0.0)

    # In-register tree reduction to an (8,128) partial; one 8-vreg RMW per step.
    out_ref[...] += val.reshape(-1, SUBLANES, LANES).sum(axis=0)


def _bce_single_kernel(x_ref, out_ref, *, steps, tile_rows, negate, n_valid,
                       needs_mask):
    """out += tile-sum of softplus(-x) if negate else softplus(x)."""
    j = pl.program_id(1)

    @pl.when(j == 0)
    def _():
        out_ref[...] = jnp.zeros_like(out_ref)

    x = x_ref[...].astype(jnp.float32)
    val = _softplus(-x) if negate else _softplus(x)

    if needs_mask:
        blk = pl.program_id(0) * steps + j
        val = jnp.where(_tail_mask(blk, tile_rows, n_valid), val, 0.0)

    out_ref[...] += val.reshape(-1, SUBLANES, LANES).sum(axis=0)


# ---------------------------------------------------------------------------
# Wrapper-side tiling / launch helpers
# ---------------------------------------------------------------------------
def _round_up(a, b):
    return -(-a // b) * b


def _sublane_multiple(dtype):
    # f32 -> 8, bf16 -> 16, int8/fp8 -> 32 (sub-32-bit packing requirement).
    itemsize = jnp.dtype(dtype).itemsize
    return SUBLANES * max(1, 4 // itemsize)


def _want_core_split():
    # Only v7x has 2 TensorCores per chip; v5e/v6e keep one reduction axis.
    try:
        return "v7" in jax.devices()[0].device_kind.lower()
    except Exception:
        return False


def _prepare(x):
    """Flatten x into a lane-dense (rows, 128) slab + static launch params."""
    n = int(x.size)
    sub = _sublane_multiple(x.dtype)
    rows = -(-n // LANES)
    tile_rows = min(MAX_TILE_ROWS, _round_up(rows, sub))
    rows_padded = max(rows, tile_rows)        # tiny inputs: pad up to one tile
    pad = rows_padded * LANES - n

    flat = x.reshape(-1)
    if pad:
        # Only hit when n % 128 != 0 (or tiny inputs); the in-kernel mask keeps
        # the semantics exact so no ln2 correction is needed.
        flat = jnp.pad(flat, (0, pad))
    slab = flat.reshape(rows_padded, LANES)

    num_blocks = -(-rows_padded // tile_rows)
    n_splits = 2 if (_want_core_split()
                     and num_blocks >= 2 * MIN_BLOCKS_PER_CORE) else 1
    steps = -(-num_blocks // n_splits)
    needs_mask = (n_splits * steps * tile_rows * LANES) != n
    return slab, tile_rows, n_splits, steps, needs_mask


def _launch(kernel_body, slabs, tile_rows, n_splits, steps, *, flops,
            transcendentals, bytes_accessed):
    in_specs = [
        pl.BlockSpec((tile_rows, LANES), lambda c, j, s=steps: (c * s + j, 0))
        for _ in slabs
    ]
    lead_sem = pltpu.CORE_PARALLEL if n_splits > 1 else pltpu.ARBITRARY
    partials = pl.pallas_call(
        kernel_body,
        out_shape=jax.ShapeDtypeStruct((n_splits * SUBLANES, LANES),
                                       jnp.float32),
        grid_spec=pltpu.PrefetchScalarGridSpec(
            num_scalar_prefetch=0,
            grid=(n_splits, steps),
            in_specs=in_specs,
            out_specs=pl.BlockSpec((SUBLANES, LANES), lambda c, j: (c, 0)),
        ),
        compiler_params=pltpu.CompilerParams(
            dimension_semantics=(lead_sem, pltpu.ARBITRARY)),
        cost_estimate=pl.CostEstimate(flops=int(flops),
                                      transcendentals=int(transcendentals),
                                      bytes_accessed=int(bytes_accessed)),
    )(*slabs)
    # tiny final reduce over the per-core (8,128) partial blocks
    return jnp.sum(partials)


# ---------------------------------------------------------------------------
# Public forward
# ---------------------------------------------------------------------------
def _mean_softplus(x, *, negate):
    """mean(softplus(-x)) if negate else mean(softplus(x))."""
    n = int(x.size)
    slab, tile_rows, n_splits, steps, needs_mask = _prepare(x)
    kern = functools.partial(_bce_single_kernel, steps=steps,
                             tile_rows=tile_rows, negate=negate, n_valid=n,
                             needs_mask=needs_mask)
    total = _launch(kern, [slab], tile_rows, n_splits, steps,
                    flops=6 * n, transcendentals=2 * n,
                    bytes_accessed=slab.size * slab.dtype.itemsize
                    + n_splits * SUBLANES * LANES * 4)
    return total / jnp.float32(n)


def _fused_loss(pred_real, pred_fake):
    """loss_real + loss_fake in one fused launch (same shape/dtype)."""
    n = int(pred_real.size)
    xr, tile_rows, n_splits, steps, needs_mask = _prepare(pred_real)
    xf, *_ = _prepare(pred_fake)
    kern = functools.partial(_bce_pair_kernel, steps=steps,
                             tile_rows=tile_rows, n_valid=n,
                             needs_mask=needs_mask)
    total = _launch(kern, [xr, xf], tile_rows, n_splits, steps,
                    flops=12 * n, transcendentals=4 * n,
                    bytes_accessed=2 * xr.size * xr.dtype.itemsize
                    + n_splits * SUBLANES * LANES * 4)
    return total / jnp.float32(n)


def bce_with_logits_forward(pred_real, pred_fake=None):
    """Pallas equivalent of BCEWithLogits.forward."""
    if pred_fake is None:
        return _mean_softplus(pred_real, negate=True)           # target = ones
    if (pred_real.shape == pred_fake.shape
            and pred_real.dtype == pred_fake.dtype):
        return _fused_loss(pred_real, pred_fake)                 # one launch
    # mismatched shapes/dtypes: two launches (BCE means are per-tensor anyway)
    return (_mean_softplus(pred_real, negate=True)
            + _mean_softplus(pred_fake, negate=False))


class BCEWithLogits:
    """Thin stateless analog of the PyTorch module."""

    def __call__(self, pred_real, pred_fake=None):
        return bce_with_logits_forward(pred_real, pred_fake)


# ---------------------------------------------------------------------------
# Reference + self-test
# ---------------------------------------------------------------------------
def _reference(pred_real, pred_fake=None):
    sp = lambda z: jnp.maximum(z, 0.0) + jnp.log1p(jnp.exp(-jnp.abs(z)))
    loss = jnp.mean(sp(-pred_real.astype(jnp.float32)))
    if pred_fake is not None:
        loss = loss + jnp.mean(sp(pred_fake.astype(jnp.float32)))
    return loss


if __name__ == "__main__":
    key = jax.random.PRNGKey(0)
    k1, k2, k3, k4, k5, k6 = jax.random.split(key, 6)

    # typical discriminator logit maps, NCHW
    pred_real = jax.random.normal(k1, (2, 4, 16, 16), dtype=jnp.float32) * 2.0
    pred_fake = jax.random.normal(k2, (2, 4, 16, 16), dtype=jnp.float32) * 2.0

    loss_fn = BCEWithLogits()
    loss_both = jax.block_until_ready(loss_fn(pred_real, pred_fake))
    loss_real = jax.block_until_ready(loss_fn(pred_real))
    assert jnp.allclose(loss_both, _reference(pred_real, pred_fake),
                        rtol=1e-5, atol=1e-5), loss_both
    assert jnp.allclose(loss_real, _reference(pred_real),
                        rtol=1e-5, atol=1e-5), loss_real

    # larger map: exercises the multi-step (2 x 1 MiB tiles per input) grid
    big_r = jax.random.normal(k3, (2, 4, 256, 256), dtype=jnp.float32) * 2.0
    big_f = jax.random.normal(k4, (2, 4, 256, 256), dtype=jnp.float32) * 2.0
    loss_big = jax.block_until_ready(loss_fn(big_r, big_f))
    assert jnp.allclose(loss_big, _reference(big_r, big_f),
                        rtol=1e-4, atol=1e-5), loss_big

    # ragged size: exercises the in-kernel tail-masking path
    odd = jax.random.normal(k5, (3, 1, 7, 11), dtype=jnp.float32) * 2.0
    loss_odd = jax.block_until_ready(loss_fn(odd, odd))
    assert jnp.allclose(loss_odd, _reference(odd, odd),
                        rtol=1e-4, atol=1e-5), loss_odd

    # mismatched shapes: two-launch fallback
    small_f = jax.random.normal(k6, (2, 4, 8, 8), dtype=jnp.float32) * 2.0
    loss_mix = jax.block_until_ready(loss_fn(pred_real, small_f))
    assert jnp.allclose(loss_mix, _reference(pred_real, small_f),
                        rtol=1e-5, atol=1e-5), loss_mix

    print("KERNEL_OK")
</pallas_src>

<mosaic_0001>
module attributes {stable_mosaic.version = 11 : i64} {
  func.func @_bce_pair_kernel(%arg0: i32, %arg1: i32, %arg2: memref<16x128xf32, #tpu.memory_space<vmem>>, %arg3: memref<16x128xf32, #tpu.memory_space<vmem>>, %arg4: memref<8x128xf32, #tpu.memory_space<vmem>>) attributes {dimension_semantics = [#tpu.dimension_semantics<arbitrary>, #tpu.dimension_semantics<arbitrary>], iteration_bounds = array<i64: 1, 1>, scalar_prefetch = 0 : i64, scratch_operands = 0 : i64, tpu.core_type = #tpu.core_type<tc>, window_params = [{transform_indices = @transform_0, window_bounds = array<i64: 16, 128>}, {transform_indices = @transform_1, window_bounds = array<i64: 16, 128>}, {transform_indices = @transform_2, window_bounds = array<i64: 8, 128>}]} {
    %c0_i32 = arith.constant 0 : i32
    %0 = arith.cmpi eq, %arg1, %c0_i32 : i32
    %1 = arith.extui %0 : i1 to i32
    %c0_i32_0 = arith.constant 0 : i32
    %2 = arith.cmpi ne, %1, %c0_i32_0 : i32
    scf.if %2 {
      %cst_13 = arith.constant 0.000000e+00 : f32
      %29 = vector.broadcast %cst_13 : f32 to vector<8x128xf32>
      %c0_14 = arith.constant 0 : index
      %c0_15 = arith.constant 0 : index
      %30 = vector.load %arg4[%c0_14, %c0_15] : memref<8x128xf32, #tpu.memory_space<vmem>>, vector<8x128xf32>
      tpu.vector_store %arg4[%c0_14, %c0_15], %29 {strides = array<i32>} : memref<8x128xf32, #tpu.memory_space<vmem>>, vector<8x128xf32>,
    } else {
    }
    %c0 = arith.constant 0 : index
    %c0_1 = arith.constant 0 : index
    %3 = vector.load %arg2[%c0, %c0_1] : memref<16x128xf32, #tpu.memory_space<vmem>>, vector<16x128xf32>
    %c0_2 = arith.constant 0 : index
    %c0_3 = arith.constant 0 : index
    %4 = vector.load %arg3[%c0_2, %c0_3] : memref<16x128xf32, #tpu.memory_space<vmem>>, vector<16x128xf32>
    %cst = arith.constant 0.000000e+00 : f32
    %5 = vector.broadcast %cst : f32 to vector<16x128xf32>
    %6 = arith.subf %5, %3 : vector<16x128xf32>
    %cst_4 = arith.constant 0.000000e+00 : f32
    %7 = vector.broadcast %cst_4 : f32 to vector<16x128xf32>
    %8 = arith.maximumf %6, %7 : vector<16x128xf32>
    %9 = math.absf %6 : vector<16x128xf32>
    %cst_5 = arith.constant 0.000000e+00 : f32
    %10 = vector.broadcast %cst_5 : f32 to vector<16x128xf32>
    %11 = arith.subf %10, %9 : vector<16x128xf32>
    %12 = math.exp %11 : vector<16x128xf32>
    %13 = math.log1p %12 : vector<16x128xf32>
    %14 = arith.addf %8, %13 : vector<16x128xf32>
    %cst_6 = arith.constant 0.000000e+00 : f32
    %15 = vector.broadcast %cst_6 : f32 to vector<16x128xf32>
    %16 = arith.maximumf %4, %15 : vector<16x128xf32>
    %17 = math.absf %4 : vector<16x128xf32>
    %cst_7 = arith.constant 0.000000e+00 : f32
    %18 = vector.broadcast %cst_7 : f32 to vector<16x128xf32>
    %19 = arith.subf %18, %17 : vector<16x128xf32>
    %20 = math.exp %19 : vector<16x128xf32>
    %21 = math.log1p %20 : vector<16x128xf32>
    %22 = arith.addf %16, %21 : vector<16x128xf32>
    %23 = arith.addf %14, %22 : vector<16x128xf32>
    %c0_8 = arith.constant 0 : index
    %c0_9 = arith.constant 0 : index
    %24 = vector.load %arg4[%c0_8, %c0_9] : memref<8x128xf32, #tpu.memory_space<vmem>>, vector<8x128xf32>
    %25 = vector.shape_cast %23 : vector<16x128xf32> to vector<2x8x128xf32>
    %cst_10 = arith.constant dense<0.000000e+00> : vector<8x128xf32>
    %26 = vector.multi_reduction <add>, %25, %cst_10 [0] : vector<2x8x128xf32> to vector<8x128xf32>
    %27 = arith.addf %24, %26 : vector<8x128xf32>
    %c0_11 = arith.constant 0 : index
    %c0_12 = arith.constant 0 : index
    %28 = vector.load %arg4[%c0_11, %c0_12] : memref<8x128xf32, #tpu.memory_space<vmem>>, vector<8x128xf32>
    tpu.vector_store %arg4[%c0_11, %c0_12], %27 {strides = array<i32>} : memref<8x128xf32, #tpu.memory_space<vmem>>, vector<8x128xf32>,
    return
  }
  func.func @transform_0(%arg0: i32, %arg1: i32) -> (i32, i32) {
    %c1_i32 = arith.constant 1 : i32
    %0 = arith.muli %arg0, %c1_i32 : i32
    %1 = arith.addi %0, %arg1 : i32
    %c0_i32 = arith.constant 0 : i32
    %c0_i32_0 = arith.constant 0 : i32
    return %1, %c0_i32 : i32, i32
  }
  func.func @transform_1(%arg0: i32, %arg1: i32) -> (i32, i32) {
    %c1_i32 = arith.constant 1 : i32
    %0 = arith.muli %arg0, %c1_i32 : i32
    %1 = arith.addi %0, %arg1 : i32
    %c0_i32 = arith.constant 0 : i32
    %c0_i32_0 = arith.constant 0 : i32
    return %1, %c0_i32 : i32, i32
  }
  func.func @transform_2(%arg0: i32, %arg1: i32) -> (i32, i32) {
    %c0_i32 = arith.constant 0 : i32
    %c0_i32_0 = arith.constant 0 : i32
    return %arg0, %c0_i32 : i32, i32
  }
}

</mosaic_0001>

<bundles_post_ra>
// kernel: tpu_custom_call.1
= control target key start
LH: loop header
LB: loop body
LE: loop exit
PB: predicated region body
PF: predicated region fallthrough
CT: control target
= control target key end

     0   :  { %7 = vsyncpa [#allocation3], 0  ;;  %s276_s0 = inlined_call_operand.hbm [shape: f32[16,128], index: 0, kind: input, shape index: {}]   ;;  %s277_s1 = inlined_call_operand.hbm [shape: f32[16,128], index: 1, kind: input, shape index: {}]   ;;  %s278_s2 = inlined_call_operand.hbm [shape: f32[8,128], index: 2, kind: output, shape index: {}]  }
   0x1   :  { %8 = vsyncpa [#allocation6], 0 }
   0x2   :  { %9 = vsyncpa [#allocation4], 0  ;;  %s233_s9 = smov [#allocation2]  }
   0x3   :  { %s19_s10 = sshll.u32 %s233_s9, 4  ;;  %s20_s10 = int_to_ptr.vmem [resolvable:$true] %s19_s10 }
   0x4   :  { %s175_s11 = scalar_lea.vmem %s20_s10, 256  ;;  %p180_p1 = scmp.lt.s32.totalorder %s20_s10, %s20_s10 }
   0x5   :  { %p176_p0 = scmp.ne.s32.totalorder %s20_s10, %s175_s11  ;;  %p181_p2 = scmp.lt.s32.totalorder %s175_s11, %s175_s11 }
   0x7   :  { %p182_p3 = por %p181_p2, %p180_p1 }
   0x9   :  { %p183_p4 = pnand %p182_p3, %p176_p0 }
   0xb   :  { %186 = shalt.err (!%p183_p4)
}
   0xc   :  { %s234_s12 = smov 128   ;;  %s235_s13 = smov 8  }
   0xd   :  { %25 = dma.hbm_to_vmem [thread:$0]  %s276_s0, 256, %s20_s10, [#allocation3], %s234_s12, %s234_s12, %s235_s13  }
   0xe   :  { %s236_s16 = smov [#allocation5]  }
   0xf   :  { %s35_s17 = sshll.u32 %s236_s16, 4  ;;  %s36_s17 = int_to_ptr.vmem [resolvable:$true] %s35_s17 }
  0x10   :  { %s195_s18 = scalar_lea.vmem %s36_s17, 256  ;;  %p200_p6 = scmp.lt.s32.totalorder %s36_s17, %s36_s17 }
  0x11   :  { %p196_p5 = scmp.ne.s32.totalorder %s36_s17, %s195_s18  ;;  %p201_p7 = scmp.lt.s32.totalorder %s195_s18, %s195_s18 }
  0x13   :  { %p202_p8 = por %p201_p7, %p200_p6 }
  0x15   :  { %p203_p9 = pnand %p202_p8, %p196_p5 }
  0x17   :  { %206 = shalt.err (!%p203_p9)
}
  0x18   :  { %41 = dma.hbm_to_vmem [thread:$0]  %s277_s1, 256, %s36_s17, [#allocation6], %s234_s12, %s234_s12, %s235_s13  }
  0x19   :  { %227 = dma.done.wait [#allocation3], 256  }
  0x1a   :  { %228 = vsyncadd [#allocation3], 4294967040 }
  0x1b   :  { %229 = dma.done.wait [#allocation6], 256  }
  0x1c   :  { %230 = vsyncadd [#allocation6], 4294967040  ;;  %v57_v0 = vld [vmem:[#allocation2] sm:$0xff]  ;;  %v58_v1 = vld [vmem:[#allocation2 + $0x8] sm:$0xff]  ;;  %s237_s0 = smov [#allocation7]  }
  0x1d   :  { %v259_v2 = vld [vmem:[#allocation5] sm:$0xff]  ;;  %v261_v3 = vld [vmem:[#allocation5 + $0x8] sm:$0xff]  ;;  %v61_v4 = vsub.f32 0.0, %v57_v0  ;;  %v62_v5 = vsub.f32 0.0, %v58_v1  ;;  %s135_s1 = sshll.u32 %s237_s0, 4  ;;  %s136_s1 = int_to_ptr.vmem [resolvable:$true] %s135_s1 }
  0x1e   :  { %v95_v6 = vand.u32 2147483647, %v259_v2  ;;  %v96_v7 = vand.u32 2147483647, %v261_v3  ;;  %v93_v36 = vmax.f32 %v259_v2, 0.0  ;;  %v94_v53 = vmax.f32 %v261_v3, 0.0  ;;  %p212_p11 = scmp.lt.s32.totalorder %s136_s1, %s136_s1 }
  0x1f   :  { %v65_v8 = vand.u32 2147483647, %v61_v4  ;;  %v66_v9 = vand.u32 2147483647, %v62_v5  ;;  %v63_v39 = vmax.f32 %v61_v4, 0.0  ;;  %v64_v49 = vmax.f32 %v62_v5, 0.0 }
  0x20   :  { %v97_v10 = vsub.f32 0.0, %v95_v6  ;;  %v98_v11 = vsub.f32 0.0, %v96_v7  ;;  %s207_s21 = scalar_lea.vmem %s136_s1, 128 }
  0x21   :  { %v67_v12 = vsub.f32 0.0, %v65_v8  ;;  %v68_v13 = vsub.f32 0.0, %v66_v9  ;;  %p208_p10 = scmp.ne.s32.totalorder %s136_s1, %s207_s21  ;;  %p213_p12 = scmp.lt.s32.totalorder %s207_s21, %s207_s21 }
  0x22   :  { %v99_v14 = vmul.f32 1.442695, %v97_v10  ;;  %v101_v17 = vmul.f32 1.442695, %v98_v11 }
  0x23   :  { %v69_v15 = vmul.f32 1.442695, %v67_v12  ;;  %v71_v16 = vmul.f32 1.442695, %v68_v13  ;;  %p214_p13 = por %p213_p12, %p212_p11 }
  0x24   :  { %151 = vpow2.f32 %v99_v14 }
  0x25   :  { %153 = vpow2.f32 %v69_v15  ;;  %p215_p0 = pnand %p214_p13, %p208_p10 }
  0x26   :  { %155 = vpow2.f32 %v71_v16 }
  0x27   :  { %157 = vpow2.f32 %v101_v17 }
  0x31   :  { %v152_v18 = vpop.eup %151 }
  0x32   :  { %v154_v19 = vpop.eup %153  ;;  %v103_v20 = vadd.f32 1.0, %v152_v18  ;;  %v106_v26 = vmul.f32 -0.5, %v152_v18  ;;  %v109_v31 = vand.u32 2147483647, %v152_v18 }
  0x33   :  { %v156_v21 = vpop.eup %155  ;;  %v73_v22 = vadd.f32 1.0, %v154_v19  ;;  %v76_v27 = vmul.f32 -0.5, %v154_v19  ;;  %v79_v33 = vand.u32 2147483647, %v154_v19 }
  0x34   :  { %v158_v23 = vpop.eup %157  ;;  %v82_v24 = vadd.f32 1.0, %v156_v21  ;;  %159 = vlog2.f32 %v103_v20  ;;  %v85_v28 = vmul.f32 -0.5, %v156_v21  ;;  %v107_v29 = vadd.f32 1.0, %v106_v26 }
  0x35   :  { %161 = vlog2.f32 %v73_v22  ;;  %v112_v25 = vadd.f32 1.0, %v158_v23  ;;  %v77_v30 = vadd.f32 1.0, %v76_v27  ;;  %v115_v32 = vmul.f32 -0.5, %v158_v23 }
  0x36   :  { %163 = vlog2.f32 %v82_v24  ;;  %v86_v34 = vadd.f32 1.0, %v85_v28  ;;  %v88_v35 = vand.u32 2147483647, %v156_v21  ;;  %v108_v37 = vmul.f32 %v152_v18, %v107_v29 }
  0x37   :  { %165 = vlog2.f32 %v112_v25  ;;  %v78_v40 = vmul.f32 %v154_v19, %v77_v30  ;;  %vm266_vm0 = vcmp.lt.f32.partialorder %v109_v31, 0.0004427343  ;;  %v116_v42 = vadd.f32 1.0, %v115_v32 }
  0x38   :  { %vm80_vm1 = vcmp.lt.f32.partialorder %v79_v33, 0.0004427343  ;;  %v87_v44 = vmul.f32 %v156_v21, %v86_v34  ;;  %v118_v46 = vand.u32 2147483647, %v158_v23  ;;  %vm89_vm2 = vcmp.lt.f32.partialorder %v88_v35, 0.0004427343 }
  0x39   :  { %v117_v54 = vmul.f32 %v158_v23, %v116_v42 }
  0x3a   :  { %vm119_vm3 = vcmp.lt.f32.partialorder %v118_v46, 0.0004427343 }
  0x41   :  { %v160_v38 = vpop.eup %159 }
  0x42   :  { %v162_v43 = vpop.eup %161  ;;  %v105_v45 = vmul.f32 0.6931472, %v160_v38 }
  0x43   :  { %v164_v47 = vpop.eup %163  ;;  %v75_v48 = vmul.f32 0.6931472, %v162_v43 }
  0x44   :  { %v84_v50 = vmul.f32 0.6931472, %v164_v47  ;;  %v111_v51 = vsel %vm266_vm0, %v108_v37, %v105_v45  ;;  %v166_v55 = vpop.eup %165 }
  0x45   :  { %v81_v52 = vsel %vm80_vm1, %v78_v40, %v75_v48  ;;  %v121_v58 = vadd.f32 %v111_v51, %v93_v36  ;;  %v114_v59 = vmul.f32 0.6931472, %v166_v55 }
  0x46   :  { %v90_v56 = vsel %vm89_vm2, %v87_v44, %v84_v50  ;;  %v91_v57 = vadd.f32 %v81_v52, %v63_v39 }
  0x47   :  { %v92_v60 = vadd.f32 %v90_v56, %v64_v49  ;;  %v120_v61 = vsel %vm119_vm3, %v117_v54, %v114_v59 }
  0x48   :  { %v122_v62 = vadd.f32 %v120_v61, %v94_v53  ;;  %v123_v63 = vadd.f32 %v121_v58, %v91_v57 }
  0x4a   :  { %v124_v0 = vadd.f32 %v122_v62, %v92_v60 }
  0x4c   :  { %v126_v1 = vadd.f32 %v124_v0, %v123_v63 }
  0x4e   :  { %128 = vst [vmem:[#allocation7] sm:$0xff] %v126_v1 }
  0x4f   :  { %218 = shalt.err (!%p215_p0)
}
  0x50   :  { %138 = dma.vmem_to_hbm [thread:$0]  %s136_s1, 128, %s278_s2, [#allocation4]  }
  0x51   :  { %231 = dma.done.wait [#allocation4], 128  }
  0x52   :  { %232 = vsyncadd [#allocation4], 4294967168 }
  0x53   :  { %142 = vsyncpa [#allocation3], 1 }
  0x54   :  { %143 = vsyncpa [#allocation6], 1 }
  0x55   :  { %144 = vsyncpa [#allocation4], 1 }

</bundles_post_ra>
